<compile_context>
chip_gen: v7x
topology: tpu7x:2x2x1
jax: 0.10.0
libtpu: 0.0.40
codegen_flags: <defaults>
</compile_context>

<pallas_src>
import math
import numpy as np

import jax
import jax.numpy as jnp
from jax.experimental import pallas as pl
from jax.experimental.pallas import tpu as pltpu


# ----------------------------------------------------------------------------
# Host-side (trace-time) interpolation tables.
# ----------------------------------------------------------------------------
def _interp_taps(in_size: int, out_size: int):
    """lo/hi indices and frac weights, align_corners=True semantics."""
    i = np.arange(out_size, dtype=np.float64)
    if out_size > 1 and in_size > 1:
        src = i * (in_size - 1) / (out_size - 1)
    else:
        src = np.zeros_like(i)
    lo = np.clip(np.floor(src).astype(np.int64), 0, in_size - 1)
    hi = np.minimum(lo + 1, in_size - 1)
    frac = src - lo
    return lo, hi, frac


def _interp_matrix(in_size: int, out_size: int) -> np.ndarray:
    """(out_size, in_size) linear-interp matrix, align_corners=True."""
    lo, hi, frac = _interp_taps(in_size, out_size)
    m = np.zeros((out_size, in_size), dtype=np.float64)
    np.add.at(m, (np.arange(out_size), lo), 1.0 - frac)
    np.add.at(m, (np.arange(out_size), hi), frac)
    return m


# ----------------------------------------------------------------------------
# VMEM accounting / block-size selection.
# ----------------------------------------------------------------------------
def _pad(n, m):
    return -(-n // m) * m


def _per_block_vmem_bytes(b, D, HW, Dout, HWout, x_item, w_item):
    in_blk = _pad(b * D, 8) * _pad(HW, 128) * x_item
    out_blk = b * _pad(Dout, 8) * _pad(HWout, 128) * x_item
    mhw = _pad(HW, 8) * _pad(HWout, 128) * w_item
    scratch = _pad(b * D, 8) * _pad(HWout, 128) * 4      # f32 intermediate
    # in/out blocks are double-buffered by the pipeline; the constant mhw
    # block is counted x2 as well (conservative: covers toolchains that
    # ignore the pl.Buffered(1) single-buffering hint).
    return 2 * (in_blk + out_blk) + 2 * mhw + scratch


def _estimate_single_step_us(b, D, HW, Dout, HWout, x_item):
    dma_bytes = b * D * HW * x_item + b * Dout * HWout * x_item
    mxu_flops = 2.0 * b * D * HW * HWout
    return max(dma_bytes / 1.0e6,       # ~1 TB/s HBM
               mxu_flops / 2.0e8)       # ~200 TF/s


def _pick_block_channels(NC, D, HW, Dout, HWout, x_item, w_item, budget):
    """Channel-slices per grid step."""
    def legal(b):
        return b == NC or ((b * D) % 8 == 0 and (b * Dout) % 8 == 0)

    def fits(b):
        return _per_block_vmem_bytes(b, D, HW, Dout, HWout,
                                     x_item, w_item) <= budget

    divs = [b for b in range(1, NC + 1) if NC % b == 0]
    ok = [b for b in divs if legal(b) and fits(b)]
    if not ok:
        # Graceful degradation: smallest legal block; caller raises the
        # vmem limit accordingly.
        return min(b for b in divs if legal(b))
    best = max(ok)
    # Only split into multiple grid steps (to shard across v7x's 2 TCs) when
    # a single step is big enough to amortize the ~0.35us/step overhead, and
    # then keep the step count even so neither TensorCore idles.
    if _estimate_single_step_us(NC, D, HW, Dout, HWout, x_item) > 2.0:
        even = [b for b in ok if (NC // b) >= 2 and (NC // b) % 2 == 0]
        if even:
            best = max(even)
    return best


# ----------------------------------------------------------------------------
# Kernels.
# ----------------------------------------------------------------------------
def _make_opt_kernel(B, D, Dout, d_lo, d_hi, d_frac):
    """Pass 1: one MXU matmul (HW interp). Pass 2: <=2-tap VPU depth combine."""
    taps = []
    for dout in range(Dout):
        lo, hi, f = int(d_lo[dout]), int(d_hi[dout]), float(d_frac[dout])
        if hi == lo or f == 0.0:
            taps.append((lo, None, 1.0, 0.0))
        else:
            taps.append((lo, hi, 1.0 - f, f))

    def kernel(x_ref, mhw_ref, o_ref, s_ref):
        # x_ref:   (B*D, H*W)        rows are (channel-slice, depth), depth minor
        # mhw_ref: (H*W, Hout*Wout)  kron(Mh, Mw)^T, resident constant
        # o_ref:   (B, Dout, Hout*Wout)
        # s_ref:   (B*D, Hout*Wout)  f32 scratch
        s_ref[...] = jnp.dot(x_ref[...], mhw_ref[...],
                             preferred_element_type=jnp.float32)
        # Depth pass on the VPU: rows feeding output depth `dout` sit at
        # sublane stride D in the scratch (one row per channel slice).
        for dout, (lo, hi, wl, wh) in enumerate(taps):
            v = s_ref[pl.ds(lo, B, stride=D), :]          # (B, Hout*Wout)
            if hi is not None:
                v = wl * v + wh * s_ref[pl.ds(hi, B, stride=D), :]
            elif wl != 1.0:
                v = wl * v
            o_ref[:, dout, :] = v.astype(o_ref.dtype)

    return kernel


def _legacy_kernel(x_ref, mhw_ref, mdb_ref, o_ref):
    """Previous proven design (two MXU matmuls) — compatibility fallback only."""
    s = jnp.dot(x_ref[...], mhw_ref[...], preferred_element_type=jnp.float32)
    o_ref[...] = jnp.dot(mdb_ref[...], s,
                         preferred_element_type=jnp.float32).astype(o_ref.dtype)


# ----------------------------------------------------------------------------
# Wrapper.
# ----------------------------------------------------------------------------
def side_up(x: jnp.ndarray, scale) -> jnp.ndarray:
    """nn.Upsample(scale_factor=scale, mode='trilinear', align_corners=True)
    on an NCDHW tensor."""
    N, C, D, H, W = x.shape
    Dout = int(math.floor(D * scale))
    Hout = int(math.floor(H * scale))
    Wout = int(math.floor(W * scale))
    NC, HW, HWout = N * C, H * W, Hout * Wout

    Mh = _interp_matrix(H, Hout)                     # (Hout, H)
    Mw = _interp_matrix(W, Wout)                     # (Wout, W)
    d_lo, d_hi, d_frac = _interp_taps(D, Dout)

    # Match the MXU operand dtype to the activations (native bf16 path when
    # possible); accumulation stays f32.
    wdtype = jnp.bfloat16 if x.dtype == jnp.bfloat16 else jnp.float32
    mhw_t = jnp.asarray(np.kron(Mh, Mw).T, dtype=wdtype)        # (HW, HWout)

    # VMEM budget from the actual chip (v5e/v6e: 128 MiB, v7x: 64 MiB/TC).
    try:
        cap = int(pltpu.get_tpu_info().vmem_capacity_bytes)
    except Exception:
        cap = 64 * 2**20                              # conservative default
    budget = int(0.40 * cap)

    x_item = x.dtype.itemsize
    w_item = jnp.dtype(wdtype).itemsize
    B = _pick_block_channels(NC, D, HW, Dout, HWout, x_item, w_item, budget)
    need = _per_block_vmem_bytes(B, D, HW, Dout, HWout, x_item, w_item)
    vmem_limit = int(min(cap, max(int(0.75 * cap), 2 * need)))

    xr = x.reshape(NC * D, HW)                        # free, contiguous reshape
    grid = (NC // B,)
    cparams = pltpu.CompilerParams(
        dimension_semantics=("parallel",),
        vmem_limit_bytes=vmem_limit,
    )

    kernel = _make_opt_kernel(B, D, Dout, d_lo, d_hi, d_frac)

    def call_optimized(single_buffer_const):
        if single_buffer_const:
            mhw_spec = pl.BlockSpec((HW, HWout), lambda i: (0, 0),
                                    pipeline_mode=pl.Buffered(buffer_count=1))
        else:
            mhw_spec = pl.BlockSpec((HW, HWout), lambda i: (0, 0))
        return pl.pallas_call(
            kernel,
            out_shape=jax.ShapeDtypeStruct((NC, Dout, HWout), x.dtype),
            grid=grid,
            in_specs=[
                pl.BlockSpec((B * D, HW), lambda i: (i, 0)),
                mhw_spec,
            ],
            out_specs=pl.BlockSpec((B, Dout, HWout), lambda i: (i, 0, 0)),
            scratch_shapes=[pltpu.VMEM((B * D, HWout), jnp.float32)],
            compiler_params=cparams,
        )(xr, mhw_t)

    def call_legacy():
        mdb = jnp.asarray(np.kron(np.eye(B), _interp_matrix(D, Dout)),
                          dtype=jnp.float32)          # (B*Dout, B*D)
        return pl.pallas_call(
            _legacy_kernel,
            out_shape=jax.ShapeDtypeStruct((NC * Dout, HWout), x.dtype),
            grid=grid,
            in_specs=[
                pl.BlockSpec((B * D, HW), lambda i: (i, 0)),
                pl.BlockSpec((HW, HWout), lambda i: (0, 0)),
                pl.BlockSpec((B * Dout, B * D), lambda i: (0, 0)),
            ],
            out_specs=pl.BlockSpec((B * Dout, HWout), lambda i: (i, 0)),
            compiler_params=cparams,
        )(xr, mhw_t, mdb)

    # Primary: optimized kernel with single-buffered constants.  Fall back to
    # default buffering, then to the proven two-matmul kernel, so the module
    # keeps working on toolchains lacking Buffered(1)/strided-slice support.
    attempts = (lambda: call_optimized(True),
                lambda: call_optimized(False),
                call_legacy)
    out, last_err = None, None
    for attempt in attempts:
        try:
            out = jax.block_until_ready(attempt())
            break
        except Exception as e:                        # compat fallback only
            last_err = e
            out = None
    if out is None:
        raise last_err

    return out.reshape(N, C, Dout, Hout, Wout)        # free reshape to 5-D


# ----------------------------------------------------------------------------
# Pure-JAX gather-based reference (matches PyTorch align_corners=True).
# ----------------------------------------------------------------------------
def ref_trilinear_align_corners(x: jnp.ndarray, scale) -> jnp.ndarray:
    N, C, D, H, W = x.shape
    Dout, Hout, Wout = int(D * scale), int(H * scale), int(W * scale)

    def coords(in_s, out_s):
        i = jnp.arange(out_s, dtype=jnp.float32)
        src = i * (in_s - 1) / (out_s - 1) if out_s > 1 else jnp.zeros_like(i)
        lo = jnp.clip(jnp.floor(src).astype(jnp.int32), 0, in_s - 1)
        hi = jnp.minimum(lo + 1, in_s - 1)
        f = src - lo.astype(jnp.float32)
        return lo, hi, f

    dl, dh_, df = coords(D, Dout)
    hl, hh, hf = coords(H, Hout)
    wl, wh, wf = coords(W, Wout)

    out = jnp.zeros((N, C, Dout, Hout, Wout), jnp.float32)
    for di, dwt in ((dl, 1.0 - df), (dh_, df)):
        for hi_, hwt in ((hl, 1.0 - hf), (hh, hf)):
            for wi, wwt in ((wl, 1.0 - wf), (wh, wf)):
                g = x[:, :, di][:, :, :, hi_][:, :, :, :, wi]
                wgt = dwt[:, None, None] * hwt[None, :, None] * wwt[None, None, :]
                out = out + g * wgt
    return out.astype(x.dtype)


if __name__ == "__main__":
    key = jax.random.PRNGKey(0)
    # Small NCDHW input consistent with a 3-D (trilinear) upsample.
    N, C, D, H, W = 2, 4, 4, 8, 8
    scale = 2
    x = jax.random.normal(key, (N, C, D, H, W), dtype=jnp.float32)

    out = jax.block_until_ready(side_up(x, scale))
    assert out.shape == (N, C, D * scale, H * scale, W * scale), out.shape
    assert out.dtype == x.dtype

    ref = ref_trilinear_align_corners(x, scale)
    assert jnp.allclose(out, ref, atol=1e-4, rtol=1e-4), (
        float(jnp.max(jnp.abs(out - ref))))

    # Native-dtype (bf16) path: bf16 x bf16 MXU matmul with f32 accumulation.
    xb = x.astype(jnp.bfloat16)
    outb = jax.block_until_ready(side_up(xb, scale))
    assert outb.shape == out.shape and outb.dtype == jnp.bfloat16
    refb = ref_trilinear_align_corners(xb.astype(jnp.float32), scale)
    assert jnp.allclose(outb.astype(jnp.float32), refb, atol=0.08, rtol=0.08), (
        float(jnp.max(jnp.abs(outb.astype(jnp.float32) - refb))))

    print("KERNEL_OK")
</pallas_src>

<mosaic_0001>
module attributes {stable_mosaic.version = 11 : i64} {
  func.func @kernel(%arg0: i32, %arg1: memref<32x64xf32, #tpu.memory_space<vmem>>, %arg2: memref<64x256xf32, #tpu.memory_space<vmem>>, %arg3: memref<8x8x256xf32, #tpu.memory_space<vmem>>, %arg4: memref<32x256xf32, #tpu.memory_space<vmem>>) attributes {dimension_semantics = [#tpu.dimension_semantics<parallel>], iteration_bounds = array<i64: 1>, scalar_prefetch = 0 : i64, scratch_operands = 1 : i64, tpu.core_type = #tpu.core_type<tc>, window_params = [{transform_indices = @transform_0, window_bounds = array<i64: 32, 64>}, {pipeline_mode = #tpu.pipeline_mode<synchronous>, transform_indices = @transform_1, window_bounds = array<i64: 64, 256>}, {transform_indices = @transform_2, window_bounds = array<i64: 8, 8, 256>}]} {
    %c0 = arith.constant 0 : index
    %c0_0 = arith.constant 0 : index
    %0 = vector.load %arg1[%c0, %c0_0] : memref<32x64xf32, #tpu.memory_space<vmem>>, vector<32x64xf32>
    %c0_1 = arith.constant 0 : index
    %c0_2 = arith.constant 0 : index
    %1 = vector.load %arg2[%c0_1, %c0_2] : memref<64x256xf32, #tpu.memory_space<vmem>>, vector<64x256xf32>
    %cst = arith.constant dense<0.000000e+00> : vector<32x256xf32>
    %2 = tpu.matmul %0, %1, %cst {dimension_numbers = #tpu.dot_dimension_numbers<[1], [0], [0], [1], [0, 0, 1, 1], [], []>} : vector<32x64xf32>, vector<64x256xf32>, vector<32x256xf32> -> vector<32x256xf32>
    %c0_3 = arith.constant 0 : index
    %c0_4 = arith.constant 0 : index
    %3 = vector.load %arg4[%c0_3, %c0_4] : memref<32x256xf32, #tpu.memory_space<vmem>>, vector<32x256xf32>
    tpu.vector_store %arg4[%c0_3, %c0_4], %2 {strides = array<i32>} : memref<32x256xf32, #tpu.memory_space<vmem>>, vector<32x256xf32>,
    %c0_5 = arith.constant 0 : index
    %c0_6 = arith.constant 0 : index
    %4 = tpu.strided_load %arg4[%c0_5, %c0_6] {strides = array<i32: 4, 1>} : memref<32x256xf32, #tpu.memory_space<vmem>>, vector<8x256xf32>
    %c0_7 = arith.constant 0 : index
    %c0_8 = arith.constant 0 : index
    %c0_9 = arith.constant 0 : index
    %5 = vector.load %arg3[%c0_7, %c0_8, %c0_9] : memref<8x8x256xf32, #tpu.memory_space<vmem>>, vector<8x1x256xf32>
    %6 = vector.shape_cast %5 : vector<8x1x256xf32> to vector<8x256xf32>
    %7 = vector.shape_cast %4 : vector<8x256xf32> to vector<8x1x256xf32>
    tpu.vector_store %arg3[%c0_7, %c0_8, %c0_9], %7 {strides = array<i32>} : memref<8x8x256xf32, #tpu.memory_space<vmem>>, vector<8x1x256xf32>,
    %c0_10 = arith.constant 0 : index
    %c0_11 = arith.constant 0 : index
    %8 = tpu.strided_load %arg4[%c0_10, %c0_11] {strides = array<i32: 4, 1>} : memref<32x256xf32, #tpu.memory_space<vmem>>, vector<8x256xf32>
    %cst_12 = arith.constant 0.571428597 : f32
    %9 = vector.broadcast %cst_12 : f32 to vector<8x256xf32>
    %10 = arith.mulf %9, %8 : vector<8x256xf32>
    %c1 = arith.constant 1 : index
    %c0_13 = arith.constant 0 : index
    %11 = tpu.strided_load %arg4[%c1, %c0_13] {strides = array<i32: 4, 1>} : memref<32x256xf32, #tpu.memory_space<vmem>>, vector<8x256xf32>
    %cst_14 = arith.constant 0.428571433 : f32
    %12 = vector.broadcast %cst_14 : f32 to vector<8x256xf32>
    %13 = arith.mulf %12, %11 : vector<8x256xf32>
    %14 = arith.addf %10, %13 : vector<8x256xf32>
    %c0_15 = arith.constant 0 : index
    %c1_16 = arith.constant 1 : index
    %c0_17 = arith.constant 0 : index
    %15 = vector.load %arg3[%c0_15, %c1_16, %c0_17] : memref<8x8x256xf32, #tpu.memory_space<vmem>>, vector<8x1x256xf32>
    %16 = vector.shape_cast %15 : vector<8x1x256xf32> to vector<8x256xf32>
    %17 = vector.shape_cast %14 : vector<8x256xf32> to vector<8x1x256xf32>
    tpu.vector_store %arg3[%c0_15, %c1_16, %c0_17], %17 {strides = array<i32>} : memref<8x8x256xf32, #tpu.memory_space<vmem>>, vector<8x1x256xf32>,
    %c0_18 = arith.constant 0 : index
    %c0_19 = arith.constant 0 : index
    %18 = tpu.strided_load %arg4[%c0_18, %c0_19] {strides = array<i32: 4, 1>} : memref<32x256xf32, #tpu.memory_space<vmem>>, vector<8x256xf32>
    %cst_20 = arith.constant 0.142857149 : f32
    %19 = vector.broadcast %cst_20 : f32 to vector<8x256xf32>
    %20 = arith.mulf %19, %18 : vector<8x256xf32>
    %c1_21 = arith.constant 1 : index
    %c0_22 = arith.constant 0 : index
    %21 = tpu.strided_load %arg4[%c1_21, %c0_22] {strides = array<i32: 4, 1>} : memref<32x256xf32, #tpu.memory_space<vmem>>, vector<8x256xf32>
    %cst_23 = arith.constant 0.857142865 : f32
    %22 = vector.broadcast %cst_23 : f32 to vector<8x256xf32>
    %23 = arith.mulf %22, %21 : vector<8x256xf32>
    %24 = arith.addf %20, %23 : vector<8x256xf32>
    %c0_24 = arith.constant 0 : index
    %c2 = arith.constant 2 : index
    %c0_25 = arith.constant 0 : index
    %25 = vector.load %arg3[%c0_24, %c2, %c0_25] : memref<8x8x256xf32, #tpu.memory_space<vmem>>, vector<8x1x256xf32>
    %26 = vector.shape_cast %25 : vector<8x1x256xf32> to vector<8x256xf32>
    %27 = vector.shape_cast %24 : vector<8x256xf32> to vector<8x1x256xf32>
    tpu.vector_store %arg3[%c0_24, %c2, %c0_25], %27 {strides = array<i32>} : memref<8x8x256xf32, #tpu.memory_space<vmem>>, vector<8x1x256xf32>,
    %c1_26 = arith.constant 1 : index
    %c0_27 = arith.constant 0 : index
    %28 = tpu.strided_load %arg4[%c1_26, %c0_27] {strides = array<i32: 4, 1>} : memref<32x256xf32, #tpu.memory_space<vmem>>, vector<8x256xf32>
    %cst_28 = arith.constant 0.714285731 : f32
    %29 = vector.broadcast %cst_28 : f32 to vector<8x256xf32>
    %30 = arith.mulf %29, %28 : vector<8x256xf32>
    %c2_29 = arith.constant 2 : index
    %c0_30 = arith.constant 0 : index
    %31 = tpu.strided_load %arg4[%c2_29, %c0_30] {strides = array<i32: 4, 1>} : memref<32x256xf32, #tpu.memory_space<vmem>>, vector<8x256xf32>
    %cst_31 = arith.constant 0.285714298 : f32
    %32 = vector.broadcast %cst_31 : f32 to vector<8x256xf32>
    %33 = arith.mulf %32, %31 : vector<8x256xf32>
    %34 = arith.addf %30, %33 : vector<8x256xf32>
    %c0_32 = arith.constant 0 : index
    %c3 = arith.constant 3 : index
    %c0_33 = arith.constant 0 : index
    %35 = vector.load %arg3[%c0_32, %c3, %c0_33] : memref<8x8x256xf32, #tpu.memory_space<vmem>>, vector<8x1x256xf32>
    %36 = vector.shape_cast %35 : vector<8x1x256xf32> to vector<8x256xf32>
    %37 = vector.shape_cast %34 : vector<8x256xf32> to vector<8x1x256xf32>
    tpu.vector_store %arg3[%c0_32, %c3, %c0_33], %37 {strides = array<i32>} : memref<8x8x256xf32, #tpu.memory_space<vmem>>, vector<8x1x256xf32>,
    %c1_34 = arith.constant 1 : index
    %c0_35 = arith.constant 0 : index
    %38 = tpu.strided_load %arg4[%c1_34, %c0_35] {strides = array<i32: 4, 1>} : memref<32x256xf32, #tpu.memory_space<vmem>>, vector<8x256xf32>
    %cst_36 = arith.constant 0.285714298 : f32
    %39 = vector.broadcast %cst_36 : f32 to vector<8x256xf32>
    %40 = arith.mulf %39, %38 : vector<8x256xf32>
    %c2_37 = arith.constant 2 : index
    %c0_38 = arith.constant 0 : index
    %41 = tpu.strided_load %arg4[%c2_37, %c0_38] {strides = array<i32: 4, 1>} : memref<32x256xf32, #tpu.memory_space<vmem>>, vector<8x256xf32>
    %cst_39 = arith.constant 0.714285731 : f32
    %42 = vector.broadcast %cst_39 : f32 to vector<8x256xf32>
    %43 = arith.mulf %42, %41 : vector<8x256xf32>
    %44 = arith.addf %40, %43 : vector<8x256xf32>
    %c0_40 = arith.constant 0 : index
    %c4 = arith.constant 4 : index
    %c0_41 = arith.constant 0 : index
    %45 = vector.load %arg3[%c0_40, %c4, %c0_41] : memref<8x8x256xf32, #tpu.memory_space<vmem>>, vector<8x1x256xf32>
    %46 = vector.shape_cast %45 : vector<8x1x256xf32> to vector<8x256xf32>
    %47 = vector.shape_cast %44 : vector<8x256xf32> to vector<8x1x256xf32>
    tpu.vector_store %arg3[%c0_40, %c4, %c0_41], %47 {strides = array<i32>} : memref<8x8x256xf32, #tpu.memory_space<vmem>>, vector<8x1x256xf32>,
    %c2_42 = arith.constant 2 : index
    %c0_43 = arith.constant 0 : index
    %48 = tpu.strided_load %arg4[%c2_42, %c0_43] {strides = array<i32: 4, 1>} : memref<32x256xf32, #tpu.memory_space<vmem>>, vector<8x256xf32>
    %cst_44 = arith.constant 0.857142865 : f32
    %49 = vector.broadcast %cst_44 : f32 to vector<8x256xf32>
    %50 = arith.mulf %49, %48 : vector<8x256xf32>
    %c3_45 = arith.constant 3 : index
    %c0_46 = arith.constant 0 : index
    %51 = tpu.strided_load %arg4[%c3_45, %c0_46] {strides = array<i32: 4, 1>} : memref<32x256xf32, #tpu.memory_space<vmem>>, vector<8x256xf32>
    %cst_47 = arith.constant 0.142857149 : f32
    %52 = vector.broadcast %cst_47 : f32 to vector<8x256xf32>
    %53 = arith.mulf %52, %51 : vector<8x256xf32>
    %54 = arith.addf %50, %53 : vector<8x256xf32>
    %c0_48 = arith.constant 0 : index
    %c5 = arith.constant 5 : index
    %c0_49 = arith.constant 0 : index
    %55 = vector.load %arg3[%c0_48, %c5, %c0_49] : memref<8x8x256xf32, #tpu.memory_space<vmem>>, vector<8x1x256xf32>
    %56 = vector.shape_cast %55 : vector<8x1x256xf32> to vector<8x256xf32>
    %57 = vector.shape_cast %54 : vector<8x256xf32> to vector<8x1x256xf32>
    tpu.vector_store %arg3[%c0_48, %c5, %c0_49], %57 {strides = array<i32>} : memref<8x8x256xf32, #tpu.memory_space<vmem>>, vector<8x1x256xf32>,
    %c2_50 = arith.constant 2 : index
    %c0_51 = arith.constant 0 : index
    %58 = tpu.strided_load %arg4[%c2_50, %c0_51] {strides = array<i32: 4, 1>} : memref<32x256xf32, #tpu.memory_space<vmem>>, vector<8x256xf32>
    %cst_52 = arith.constant 0.428571433 : f32
    %59 = vector.broadcast %cst_52 : f32 to vector<8x256xf32>
    %60 = arith.mulf %59, %58 : vector<8x256xf32>
    %c3_53 = arith.constant 3 : index
    %c0_54 = arith.constant 0 : index
    %61 = tpu.strided_load %arg4[%c3_53, %c0_54] {strides = array<i32: 4, 1>} : memref<32x256xf32, #tpu.memory_space<vmem>>, vector<8x256xf32>
    %cst_55 = arith.constant 0.571428597 : f32
    %62 = vector.broadcast %cst_55 : f32 to vector<8x256xf32>
    %63 = arith.mulf %62, %61 : vector<8x256xf32>
    %64 = arith.addf %60, %63 : vector<8x256xf32>
    %c0_56 = arith.constant 0 : index
    %c6 = arith.constant 6 : index
    %c0_57 = arith.constant 0 : index
    %65 = vector.load %arg3[%c0_56, %c6, %c0_57] : memref<8x8x256xf32, #tpu.memory_space<vmem>>, vector<8x1x256xf32>
    %66 = vector.shape_cast %65 : vector<8x1x256xf32> to vector<8x256xf32>
    %67 = vector.shape_cast %64 : vector<8x256xf32> to vector<8x1x256xf32>
    tpu.vector_store %arg3[%c0_56, %c6, %c0_57], %67 {strides = array<i32>} : memref<8x8x256xf32, #tpu.memory_space<vmem>>, vector<8x1x256xf32>,
    %c3_58 = arith.constant 3 : index
    %c0_59 = arith.constant 0 : index
    %68 = tpu.strided_load %arg4[%c3_58, %c0_59] {strides = array<i32: 4, 1>} : memref<32x256xf32, #tpu.memory_space<vmem>>, vector<8x256xf32>
    %c0_60 = arith.constant 0 : index
    %c7 = arith.constant 7 : index
    %c0_61 = arith.constant 0 : index
    %69 = vector.load %arg3[%c0_60, %c7, %c0_61] : memref<8x8x256xf32, #tpu.memory_space<vmem>>, vector<8x1x256xf32>
    %70 = vector.shape_cast %69 : vector<8x1x256xf32> to vector<8x256xf32>
    %71 = vector.shape_cast %68 : vector<8x256xf32> to vector<8x1x256xf32>
    tpu.vector_store %arg3[%c0_60, %c7, %c0_61], %71 {strides = array<i32>} : memref<8x8x256xf32, #tpu.memory_space<vmem>>, vector<8x1x256xf32>,
    return
  }
  func.func @transform_0(%arg0: i32) -> (i32, i32) {
    %c0_i32 = arith.constant 0 : i32
    %c0_i32_0 = arith.constant 0 : i32
    return %arg0, %c0_i32 : i32, i32
  }
  func.func @transform_1(%arg0: i32) -> (i32, i32) {
    %c0_i32 = arith.constant 0 : i32
    %c0_i32_0 = arith.constant 0 : i32
    %c0_i32_1 = arith.constant 0 : i32
    return %c0_i32, %c0_i32_0 : i32, i32
  }
  func.func @transform_2(%arg0: i32) -> (i32, i32, i32) {
    %c0_i32 = arith.constant 0 : i32
    %c0_i32_0 = arith.constant 0 : i32
    %c0_i32_1 = arith.constant 0 : i32
    return %arg0, %c0_i32, %c0_i32_0 : i32, i32, i32
  }
}

module attributes {stable_mosaic.version = 11 : i64} {
  func.func @kernel(%arg0: i32, %arg1: memref<32x64xf32, #tpu.memory_space<vmem>>, %arg2: memref<64x256xf32, #tpu.memory_space<vmem>>, %arg3: memref<8x8x256xf32, #tpu.memory_space<vmem>>, %arg4: memref<32x256xf32, #tpu.memory_space<vmem>>) attributes {dimension_semantics = [#tpu.dimension_semantics<parallel>], iteration_bounds = array<i64: 1>, scalar_prefetch = 0 : i64, scratch_operands = 1 : i64, tpu.core_type = #tpu.core_type<tc>, window_params = [{transform_indices = @transform_0, window_bounds = array<i64: 32, 64>}, {pipeline_mode = #tpu.pipeline_mode<synchronous>, transform_indices = @transform_1, window_bounds = array<i64: 64, 256>}, {transform_indices = @transform_2, window_bounds = array<i64: 8, 8, 256>}]} {
    %c0 = arith.constant 0 : index
    %c0_0 = arith.constant 0 : index
    %0 = vector.load %arg1[%c0, %c0_0] : memref<32x64xf32, #tpu.memory_space<vmem>>, vector<32x64xf32>
    %c0_1 = arith.constant 0 : index
    %c0_2 = arith.constant 0 : index
    %1 = vector.load %arg2[%c0_1, %c0_2] : memref<64x256xf32, #tpu.memory_space<vmem>>, vector<64x256xf32>
    %cst = arith.constant dense<0.000000e+00> : vector<32x256xf32>
    %2 = tpu.matmul %0, %1, %cst {dimension_numbers = #tpu.dot_dimension_numbers<[1], [0], [0], [1], [0, 0, 1, 1], [], []>} : vector<32x64xf32>, vector<64x256xf32>, vector<32x256xf32> -> vector<32x256xf32>
    %c0_3 = arith.constant 0 : index
    %c0_4 = arith.constant 0 : index
    %3 = vector.load %arg4[%c0_3, %c0_4] : memref<32x256xf32, #tpu.memory_space<vmem>>, vector<32x256xf32>
    tpu.vector_store %arg4[%c0_3, %c0_4], %2 {strides = array<i32>} : memref<32x256xf32, #tpu.memory_space<vmem>>, vector<32x256xf32>,
    %c0_5 = arith.constant 0 : index
    %c0_6 = arith.constant 0 : index
    %4 = tpu.strided_load %arg4[%c0_5, %c0_6] {strides = array<i32: 4, 1>} : memref<32x256xf32, #tpu.memory_space<vmem>>, vector<8x256xf32>
    %c0_7 = arith.constant 0 : index
    %c0_8 = arith.constant 0 : index
    %c0_9 = arith.constant 0 : index
    %5 = vector.load %arg3[%c0_7, %c0_8, %c0_9] : memref<8x8x256xf32, #tpu.memory_space<vmem>>, vector<8x1x256xf32>
    %6 = vector.shape_cast %5 : vector<8x1x256xf32> to vector<8x256xf32>
    %7 = vector.shape_cast %4 : vector<8x256xf32> to vector<8x1x256xf32>
    tpu.vector_store %arg3[%c0_7, %c0_8, %c0_9], %7 {strides = array<i32>} : memref<8x8x256xf32, #tpu.memory_space<vmem>>, vector<8x1x256xf32>,
    %c0_10 = arith.constant 0 : index
    %c0_11 = arith.constant 0 : index
    %8 = tpu.strided_load %arg4[%c0_10, %c0_11] {strides = array<i32: 4, 1>} : memref<32x256xf32, #tpu.memory_space<vmem>>, vector<8x256xf32>
    %cst_12 = arith.constant 0.571428597 : f32
    %9 = vector.broadcast %cst_12 : f32 to vector<8x256xf32>
    %10 = arith.mulf %9, %8 : vector<8x256xf32>
    %c1 = arith.constant 1 : index
    %c0_13 = arith.constant 0 : index
    %11 = tpu.strided_load %arg4[%c1, %c0_13] {strides = array<i32: 4, 1>} : memref<32x256xf32, #tpu.memory_space<vmem>>, vector<8x256xf32>
    %cst_14 = arith.constant 0.428571433 : f32
    %12 = vector.broadcast %cst_14 : f32 to vector<8x256xf32>
    %13 = arith.mulf %12, %11 : vector<8x256xf32>
    %14 = arith.addf %10, %13 : vector<8x256xf32>
    %c0_15 = arith.constant 0 : index
    %c1_16 = arith.constant 1 : index
    %c0_17 = arith.constant 0 : index
    %15 = vector.load %arg3[%c0_15, %c1_16, %c0_17] : memref<8x8x256xf32, #tpu.memory_space<vmem>>, vector<8x1x256xf32>
    %16 = vector.shape_cast %15 : vector<8x1x256xf32> to vector<8x256xf32>
    %17 = vector.shape_cast %14 : vector<8x256xf32> to vector<8x1x256xf32>
    tpu.vector_store %arg3[%c0_15, %c1_16, %c0_17], %17 {strides = array<i32>} : memref<8x8x256xf32, #tpu.memory_space<vmem>>, vector<8x1x256xf32>,
    %c0_18 = arith.constant 0 : index
    %c0_19 = arith.constant 0 : index
    %18 = tpu.strided_load %arg4[%c0_18, %c0_19] {strides = array<i32: 4, 1>} : memref<32x256xf32, #tpu.memory_space<vmem>>, vector<8x256xf32>
    %cst_20 = arith.constant 0.142857149 : f32
    %19 = vector.broadcast %cst_20 : f32 to vector<8x256xf32>
    %20 = arith.mulf %19, %18 : vector<8x256xf32>
    %c1_21 = arith.constant 1 : index
    %c0_22 = arith.constant 0 : index
    %21 = tpu.strided_load %arg4[%c1_21, %c0_22] {strides = array<i32: 4, 1>} : memref<32x256xf32, #tpu.memory_space<vmem>>, vector<8x256xf32>
    %cst_23 = arith.constant 0.857142865 : f32
    %22 = vector.broadcast %cst_23 : f32 to vector<8x256xf32>
    %23 = arith.mulf %22, %21 : vector<8x256xf32>
    %24 = arith.addf %20, %23 : vector<8x256xf32>
    %c0_24 = arith.constant 0 : index
    %c2 = arith.constant 2 : index
    %c0_25 = arith.constant 0 : index
    %25 = vector.load %arg3[%c0_24, %c2, %c0_25] : memref<8x8x256xf32, #tpu.memory_space<vmem>>, vector<8x1x256xf32>
    %26 = vector.shape_cast %25 : vector<8x1x256xf32> to vector<8x256xf32>
    %27 = vector.shape_cast %24 : vector<8x256xf32> to vector<8x1x256xf32>
    tpu.vector_store %arg3[%c0_24, %c2, %c0_25], %27 {strides = array<i32>} : memref<8x8x256xf32, #tpu.memory_space<vmem>>, vector<8x1x256xf32>,
    %c1_26 = arith.constant 1 : index
    %c0_27 = arith.constant 0 : index
    %28 = tpu.strided_load %arg4[%c1_26, %c0_27] {strides = array<i32: 4, 1>} : memref<32x256xf32, #tpu.memory_space<vmem>>, vector<8x256xf32>
    %cst_28 = arith.constant 0.714285731 : f32
    %29 = vector.broadcast %cst_28 : f32 to vector<8x256xf32>
    %30 = arith.mulf %29, %28 : vector<8x256xf32>
    %c2_29 = arith.constant 2 : index
    %c0_30 = arith.constant 0 : index
    %31 = tpu.strided_load %arg4[%c2_29, %c0_30] {strides = array<i32: 4, 1>} : memref<32x256xf32, #tpu.memory_space<vmem>>, vector<8x256xf32>
    %cst_31 = arith.constant 0.285714298 : f32
    %32 = vector.broadcast %cst_31 : f32 to vector<8x256xf32>
    %33 = arith.mulf %32, %31 : vector<8x256xf32>
    %34 = arith.addf %30, %33 : vector<8x256xf32>
    %c0_32 = arith.constant 0 : index
    %c3 = arith.constant 3 : index
    %c0_33 = arith.constant 0 : index
    %35 = vector.load %arg3[%c0_32, %c3, %c0_33] : memref<8x8x256xf32, #tpu.memory_space<vmem>>, vector<8x1x256xf32>
    %36 = vector.shape_cast %35 : vector<8x1x256xf32> to vector<8x256xf32>
    %37 = vector.shape_cast %34 : vector<8x256xf32> to vector<8x1x256xf32>
    tpu.vector_store %arg3[%c0_32, %c3, %c0_33], %37 {strides = array<i32>} : memref<8x8x256xf32, #tpu.memory_space<vmem>>, vector<8x1x256xf32>,
    %c1_34 = arith.constant 1 : index
    %c0_35 = arith.constant 0 : index
    %38 = tpu.strided_load %arg4[%c1_34, %c0_35] {strides = array<i32: 4, 1>} : memref<32x256xf32, #tpu.memory_space<vmem>>, vector<8x256xf32>
    %cst_36 = arith.constant 0.285714298 : f32
    %39 = vector.broadcast %cst_36 : f32 to vector<8x256xf32>
    %40 = arith.mulf %39, %38 : vector<8x256xf32>
    %c2_37 = arith.constant 2 : index
    %c0_38 = arith.constant 0 : index
    %41 = tpu.strided_load %arg4[%c2_37, %c0_38] {strides = array<i32: 4, 1>} : memref<32x256xf32, #tpu.memory_space<vmem>>, vector<8x256xf32>
    %cst_39 = arith.constant 0.714285731 : f32
    %42 = vector.broadcast %cst_39 : f32 to vector<8x256xf32>
    %43 = arith.mulf %42, %41 : vector<8x256xf32>
    %44 = arith.addf %40, %43 : vector<8x256xf32>
    %c0_40 = arith.constant 0 : index
    %c4 = arith.constant 4 : index
    %c0_41 = arith.constant 0 : index
    %45 = vector.load %arg3[%c0_40, %c4, %c0_41] : memref<8x8x256xf32, #tpu.memory_space<vmem>>, vector<8x1x256xf32>
    %46 = vector.shape_cast %45 : vector<8x1x256xf32> to vector<8x256xf32>
    %47 = vector.shape_cast %44 : vector<8x256xf32> to vector<8x1x256xf32>
    tpu.vector_store %arg3[%c0_40, %c4, %c0_41], %47 {strides = array<i32>} : memref<8x8x256xf32, #tpu.memory_space<vmem>>, vector<8x1x256xf32>,
    %c2_42 = arith.constant 2 : index
    %c0_43 = arith.constant 0 : index
    %48 = tpu.strided_load %arg4[%c2_42, %c0_43] {strides = array<i32: 4, 1>} : memref<32x256xf32, #tpu.memory_space<vmem>>, vector<8x256xf32>
    %cst_44 = arith.constant 0.857142865 : f32
    %49 = vector.broadcast %cst_44 : f32 to vector<8x256xf32>
    %50 = arith.mulf %49, %48 : vector<8x256xf32>
    %c3_45 = arith.constant 3 : index
    %c0_46 = arith.constant 0 : index
    %51 = tpu.strided_load %arg4[%c3_45, %c0_46] {strides = array<i32: 4, 1>} : memref<32x256xf32, #tpu.memory_space<vmem>>, vector<8x256xf32>
    %cst_47 = arith.constant 0.142857149 : f32
    %52 = vector.broadcast %cst_47 : f32 to vector<8x256xf32>
    %53 = arith.mulf %52, %51 : vector<8x256xf32>
    %54 = arith.addf %50, %53 : vector<8x256xf32>
    %c0_48 = arith.constant 0 : index
    %c5 = arith.constant 5 : index
    %c0_49 = arith.constant 0 : index
    %55 = vector.load %arg3[%c0_48, %c5, %c0_49] : memref<8x8x256xf32, #tpu.memory_space<vmem>>, vector<8x1x256xf32>
    %56 = vector.shape_cast %55 : vector<8x1x256xf32> to vector<8x256xf32>
    %57 = vector.shape_cast %54 : vector<8x256xf32> to vector<8x1x256xf32>
    tpu.vector_store %arg3[%c0_48, %c5, %c0_49], %57 {strides = array<i32>} : memref<8x8x256xf32, #tpu.memory_space<vmem>>, vector<8x1x256xf32>,
    %c2_50 = arith.constant 2 : index
    %c0_51 = arith.constant 0 : index
    %58 = tpu.strided_load %arg4[%c2_50, %c0_51] {strides = array<i32: 4, 1>} : memref<32x256xf32, #tpu.memory_space<vmem>>, vector<8x256xf32>
    %cst_52 = arith.constant 0.428571433 : f32
    %59 = vector.broadcast %cst_52 : f32 to vector<8x256xf32>
    %60 = arith.mulf %59, %58 : vector<8x256xf32>
    %c3_53 = arith.constant 3 : index
    %c0_54 = arith.constant 0 : index
    %61 = tpu.strided_load %arg4[%c3_53, %c0_54] {strides = array<i32: 4, 1>} : memref<32x256xf32, #tpu.memory_space<vmem>>, vector<8x256xf32>
    %cst_55 = arith.constant 0.571428597 : f32
    %62 = vector.broadcast %cst_55 : f32 to vector<8x256xf32>
    %63 = arith.mulf %62, %61 : vector<8x256xf32>
    %64 = arith.addf %60, %63 : vector<8x256xf32>
    %c0_56 = arith.constant 0 : index
    %c6 = arith.constant 6 : index
    %c0_57 = arith.constant 0 : index
    %65 = vector.load %arg3[%c0_56, %c6, %c0_57] : memref<8x8x256xf32, #tpu.memory_space<vmem>>, vector<8x1x256xf32>
    %66 = vector.shape_cast %65 : vector<8x1x256xf32> to vector<8x256xf32>
    %67 = vector.shape_cast %64 : vector<8x256xf32> to vector<8x1x256xf32>
    tpu.vector_store %arg3[%c0_56, %c6, %c0_57], %67 {strides = array<i32>} : memref<8x8x256xf32, #tpu.memory_space<vmem>>, vector<8x1x256xf32>,
    %c3_58 = arith.constant 3 : index
    %c0_59 = arith.constant 0 : index
    %68 = tpu.strided_load %arg4[%c3_58, %c0_59] {strides = array<i32: 4, 1>} : memref<32x256xf32, #tpu.memory_space<vmem>>, vector<8x256xf32>
    %c0_60 = arith.constant 0 : index
    %c7 = arith.constant 7 : index
    %c0_61 = arith.constant 0 : index
    %69 = vector.load %arg3[%c0_60, %c7, %c0_61] : memref<8x8x256xf32, #tpu.memory_space<vmem>>, vector<8x1x256xf32>
    %70 = vector.shape_cast %69 : vector<8x1x256xf32> to vector<8x256xf32>
    %71 = vector.shape_cast %68 : vector<8x256xf32> to vector<8x1x256xf32>
    tpu.vector_store %arg3[%c0_60, %c7, %c0_61], %71 {strides = array<i32>} : memref<8x8x256xf32, #tpu.memory_space<vmem>>, vector<8x1x256xf32>,
    return
  }
  func.func @transform_0(%arg0: i32) -> (i32, i32) {
    %c0_i32 = arith.constant 0 : i32
    %c0_i32_0 = arith.constant 0 : i32
    return %arg0, %c0_i32 : i32, i32
  }
  func.func @transform_1(%arg0: i32) -> (i32, i32) {
    %c0_i32 = arith.constant 0 : i32
    %c0_i32_0 = arith.constant 0 : i32
    %c0_i32_1 = arith.constant 0 : i32
    return %c0_i32, %c0_i32_0 : i32, i32
  }
  func.func @transform_2(%arg0: i32) -> (i32, i32, i32) {
    %c0_i32 = arith.constant 0 : i32
    %c0_i32_0 = arith.constant 0 : i32
    %c0_i32_1 = arith.constant 0 : i32
    return %arg0, %c0_i32, %c0_i32_0 : i32, i32, i32
  }
}

module attributes {stable_mosaic.version = 11 : i64} {
  func.func @_legacy_kernel(%arg0: i32, %arg1: memref<32x64xf32, #tpu.memory_space<vmem>>, %arg2: memref<64x256xf32, #tpu.memory_space<vmem>>, %arg3: memref<64x32xf32, #tpu.memory_space<vmem>>, %arg4: memref<64x256xf32, #tpu.memory_space<vmem>>) attributes {dimension_semantics = [#tpu.dimension_semantics<parallel>], iteration_bounds = array<i64: 1>, scalar_prefetch = 0 : i64, scratch_operands = 0 : i64, tpu.core_type = #tpu.core_type<tc>, window_params = [{transform_indices = @transform_0, window_bounds = array<i64: 32, 64>}, {pipeline_mode = #tpu.pipeline_mode<synchronous>, transform_indices = @transform_1, window_bounds = array<i64: 64, 256>}, {pipeline_mode = #tpu.pipeline_mode<synchronous>, transform_indices = @transform_2, window_bounds = array<i64: 64, 32>}, {transform_indices = @transform_3, window_bounds = array<i64: 64, 256>}]} {
    %c0 = arith.constant 0 : index
    %c0_0 = arith.constant 0 : index
    %0 = vector.load %arg1[%c0, %c0_0] : memref<32x64xf32, #tpu.memory_space<vmem>>, vector<32x64xf32>
    %c0_1 = arith.constant 0 : index
    %c0_2 = arith.constant 0 : index
    %1 = vector.load %arg2[%c0_1, %c0_2] : memref<64x256xf32, #tpu.memory_space<vmem>>, vector<64x256xf32>
    %cst = arith.constant dense<0.000000e+00> : vector<32x256xf32>
    %2 = tpu.matmul %0, %1, %cst {dimension_numbers = #tpu.dot_dimension_numbers<[1], [0], [0], [1], [0, 0, 1, 1], [], []>} : vector<32x64xf32>, vector<64x256xf32>, vector<32x256xf32> -> vector<32x256xf32>
    %c0_3 = arith.constant 0 : index
    %c0_4 = arith.constant 0 : index
    %3 = vector.load %arg3[%c0_3, %c0_4] : memref<64x32xf32, #tpu.memory_space<vmem>>, vector<64x32xf32>
    %cst_5 = arith.constant dense<0.000000e+00> : vector<64x256xf32>
    %4 = tpu.matmul %3, %2, %cst_5 {dimension_numbers = #tpu.dot_dimension_numbers<[1], [0], [0], [1], [0, 0, 1, 1], [], []>} : vector<64x32xf32>, vector<32x256xf32>, vector<64x256xf32> -> vector<64x256xf32>
    %c0_6 = arith.constant 0 : index
    %c0_7 = arith.constant 0 : index
    %5 = vector.load %arg4[%c0_6, %c0_7] : memref<64x256xf32, #tpu.memory_space<vmem>>, vector<64x256xf32>
    tpu.vector_store %arg4[%c0_6, %c0_7], %4 {strides = array<i32>} : memref<64x256xf32, #tpu.memory_space<vmem>>, vector<64x256xf32>,
    return
  }
  func.func @transform_0(%arg0: i32) -> (i32, i32) {
    %c0_i32 = arith.constant 0 : i32
    %c0_i32_0 = arith.constant 0 : i32
    return %arg0, %c0_i32 : i32, i32
  }
  func.func @transform_1(%arg0: i32) -> (i32, i32) {
    %c0_i32 = arith.constant 0 : i32
    %c0_i32_0 = arith.constant 0 : i32
    %c0_i32_1 = arith.constant 0 : i32
    return %c0_i32, %c0_i32_0 : i32, i32
  }
  func.func @transform_2(%arg0: i32) -> (i32, i32) {
    %c0_i32 = arith.constant 0 : i32
    %c0_i32_0 = arith.constant 0 : i32
    %c0_i32_1 = arith.constant 0 : i32
    return %c0_i32, %c0_i32_0 : i32, i32
  }
  func.func @transform_3(%arg0: i32) -> (i32, i32) {
    %c0_i32 = arith.constant 0 : i32
    %c0_i32_0 = arith.constant 0 : i32
    return %arg0, %c0_i32 : i32, i32
  }
}

</mosaic_0001>

<bundles_post_ra>
// kernel: tpu_custom_call.1
= control target key start
LH: loop header
LB: loop body
LE: loop exit
PB: predicated region body
PF: predicated region fallthrough
CT: control target
= control target key end

     0   :  { %8 = vsyncpa [#allocation3], 0  ;;  %s534_s0 = inlined_call_operand.vmem [shape: f32[32,64], index: 0, kind: input, shape index: {}]   ;;  %s535_s1 = inlined_call_operand.hbm [shape: f32[64,256], index: 1, kind: input, shape index: {}]   ;;  %s536_s2 = inlined_call_operand.vmem [shape: f32[64,32], index: 2, kind: input, shape index: {}]   ;;  %s537_s3 = inlined_call_operand.hbm [shape: f32[64,256], index: 3, kind: output, shape index: {}]  }
   0x1   :  { %9 = vsyncpa [#allocation4], 0  ;;  %s423_s12 = smov [#allocation2]   ;;  %s375_s16 = scalar_lea.hbm %s535_s1, 2048 }
   0x2   :  { %s17_s13 = sshll.u32 %s423_s12, 4  ;;  %p376_p0 = scmp.ne.s32.totalorder %s535_s1, %s375_s16  ;;  %s18_s13 = int_to_ptr.vmem [resolvable:$true] %s17_s13 }
   0x3   :  { %p379_p1 = scmp.lt.u32.totalorder %s375_s16, %s535_s1 }
   0x5   :  { %p381_p2 = pnand %p379_p1, %p376_p0 }
   0x7   :  { %384 = shalt.err (!%p381_p2)
}
   0x8   :  { %s385_s21 = scalar_lea.vmem %s18_s13, 2048  ;;  %p390_p4 = scmp.lt.s32.totalorder %s18_s13, %s18_s13 }
   0x9   :  { %p386_p3 = scmp.ne.s32.totalorder %s18_s13, %s385_s21  ;;  %p391_p5 = scmp.lt.s32.totalorder %s385_s21, %s385_s21 }
   0xb   :  { %p392_p6 = por %p391_p5, %p390_p4 }
   0xd   :  { %p393_p7 = pnand %p392_p6, %p386_p3 }
   0xf   :  { %396 = shalt.err (!%p393_p7)
}
  0x10   :  { %s424_s22 = smov 256   ;;  %s425_s23 = smov 16  }
  0x11   :  { %23 = dma.hbm_to_vmem [thread:$0]  %s535_s1, 2048, %s18_s13, [#allocation3], %s424_s22, %s424_s22, %s425_s23  }
  0x12   :  { %419 = dma.done.wait [#allocation3], 2048  }
  0x13   :  { %420 = vsyncadd [#allocation3], 4294965248  ;;  %v426_v0 = vmov 0.0   ;;  %v34_v1 = vld [vmem:[#allocation2 + $0x8] sm:$0xff]  ;;  %v36_v2 = vld [vmem:[#allocation2 + $0x18] sm:$0xff]  ;;  %vm49_vm0 = vcmask 523264  }
  0x14   :  { %126 = vmatprep.mubr.f32.mxu0 %v426_v0  ;;  %254 = vmatprep.mubr.f32.mxu1 %v426_v0  ;;  %v33_v3 = vld [vmem:[#allocation2] sm:$0xff]  ;;  %v342_v4 = vpack.c.bf16 %v36_v2, %v34_v1  ;;  %v35_v5 = vld [vmem:[#allocation2 + $0x10] sm:$0xff]  ;;  %v38_v6 = vld [vmem:[#allocation2 + $0x28] sm:$0xff]  ;;  %vm159_vm1 = vcmask 261120  }
  0x15   :  { %v40_v7 = vld [vmem:[#allocation2 + $0x38] sm:$0xff]  ;;  %v344_v8 = vpack.c.bf16 %v35_v5, %v33_v3  ;;  %v37_v10 = vld [vmem:[#allocation2 + $0x20] sm:$0xff]  ;;  %v39_v11 = vld [vmem:[#allocation2 + $0x30] sm:$0xff] }
  0x16   :  { %v346_v9 = vpack.c.bf16 %v40_v7, %v38_v6  ;;  %v42_v12 = vld [vmem:[#allocation2 + $0x48] sm:$0xff]  ;;  %343 = vmatprep.subr.bf16.mxu0 %v342_v4  ;;  %v44_v13 = vld [vmem:[#allocation2 + $0x58] sm:$0xff]  ;;  %v348_v14 = vpack.c.bf16 %v39_v11, %v37_v10  ;;  %v41_v16 = vld [vmem:[#allocation2 + $0x40] sm:$0xff] }
  0x17   :  { %345 = vmatpush1.bf16.msra.mxu0 %v344_v8  ;;  %v350_v15 = vpack.c.bf16 %v44_v13, %v42_v12  ;;  %v43_v17 = vld [vmem:[#allocation2 + $0x50] sm:$0xff]  ;;  %v46_v18 = vld [vmem:[#allocation2 + $0x68] sm:$0xff]  ;;  %v48_v19 = vld [vmem:[#allocation2 + $0x78] sm:$0xff] }
  0x18   :  { %347 = vmatprep.subr.bf16.mxu0 %v346_v9  ;;  %v352_v20 = vpack.c.bf16 %v43_v17, %v41_v16  ;;  %v354_v21 = vpack.c.bf16 %v48_v19, %v46_v18  ;;  %v45_v22 = vld [vmem:[#allocation2 + $0x60] sm:$0xff]  ;;  %v47_v23 = vld [vmem:[#allocation2 + $0x70] sm:$0xff]  ;;  %v30_v26 = vld [vmem:[%s534_s0 + $0x8] sm:$0xff] }
  0x19   :  { %v356_v24 = vpack.c.bf16 %v47_v23, %v45_v22  ;;  %v29_v25 = vld [vmem:[%s534_s0] sm:$0xff]  ;;  %v31_v27 = vld [vmem:[%s534_s0 + $0x10] sm:$0xff]  ;;  %v32_v28 = vld [vmem:[%s534_s0 + $0x18] sm:$0xff] }
  0x1a   :  { %v152_v41 = vld [vmem:[%s536_s2 + $0x8] sm:$0xff]  ;;  %v151_v42 = vld [vmem:[%s536_s2] sm:$0xff]  ;;  %v153_v43 = vld [vmem:[%s536_s2 + $0x10] sm:$0xff] }
  0x1b   :  { %349 = vmatpush1.bf16.msra.mxu0 %v348_v14  ;;  %v154_v44 = vld [vmem:[%s536_s2 + $0x18] sm:$0xff]  ;;  %v155_v45 = vld [vmem:[%s536_s2 + $0x20] sm:$0xff]  ;;  %v156_v46 = vld [vmem:[%s536_s2 + $0x28] sm:$0xff] }
  0x1c   :  { %351 = vmatprep.subr.bf16.mxu0 %v350_v15  ;;  %v157_v47 = vld [vmem:[%s536_s2 + $0x30] sm:$0xff]  ;;  %v158_v48 = vld [vmem:[%s536_s2 + $0x38] sm:$0xff]  ;;  %s427_s2 = smov [#allocation5]  }
  0x1d   :  { %s318_s21 = sshll.u32 %s427_s2, 4  ;;  %s319_s21 = int_to_ptr.vmem [resolvable:$true] %s318_s21 }
  0x1e   :  { %s397_s24 = scalar_lea.vmem %s319_s21, 2048  ;;  %p402_p9 = scmp.lt.s32.totalorder %s319_s21, %s319_s21 }
  0x1f   :  { %353 = vmatpush1.bf16.msra.mxu0 %v352_v20  ;;  %p398_p8 = scmp.ne.s32.totalorder %s319_s21, %s397_s24  ;;  %p403_p10 = scmp.lt.s32.totalorder %s397_s24, %s397_s24 }
  0x20   :  { %355 = vmatprep.subr.bf16.mxu0 %v354_v21 }
  0x21   :  { %p404_p11 = por %p403_p10, %p402_p9 }
  0x23   :  { %357 = vmatpush1.bf16.msra.mxu0 %v356_v24  ;;  %p405_p12 = pnand %p404_p11, %p398_p8 }
  0x26   :  { %330 = vmatmul.mubr.msk.f32.vlgmr.msra.gmra.mrb[0].mxu0 %vm49_vm0, %v29_v25 }
  0x27   :  { %132 = vmatprep.mubr.f32.mxu0 %v426_v0 }
  0x2a   :  { %331 = vmatmul.mubr.msk.f32.gmra.mrb[2].mxu0 %vm49_vm0, %v30_v26 }
  0x2b   :  { %138 = vmatprep.mubr.f32.mxu0 %v426_v0 }
  0x2e   :  { %332 = vmatmul.mubr.msk.f32.gmra.mrb[4].mxu0 %vm49_vm0, %v31_v27 }
  0x2f   :  { %144 = vmatprep.mubr.f32.mxu0 %v426_v0 }
  0x32   :  { %333 = vmatmul.mubr.msk.f32.gmra.mrb[6].mxu0 %vm49_vm0, %v32_v28 }
  0x33   :  { %248 = vmatprep.mubr.f32.mxu0 %v426_v0 }
  0xf9   :  { %v128_v29 = vpop.f32.mrb[0].mxu0 }
  0xfa   :  { %v130_v30 = vpop.f32.mrb[1].mxu0 }
  0xfd   :  { %v134_v31 = vpop.f32.mrb[2].mxu0 }
  0xfe   :  { %v360_v32 = vpack.c.bf16 %v134_v31, %v128_v29  ;;  %v136_v33 = vpop.f32.mrb[3].mxu0 }
  0xff   :  { %v358_v34 = vpack.c.bf16 %v136_v33, %v130_v30 }
 0x101   :  { %v140_v35 = vpop.f32.mrb[4].mxu0  ;;  %359 = vmatprep.subr.bf16.mxu0 %v358_v34  ;;  %366 = vmatprep.subr.bf16.mxu1 %v358_v34 }
 0x102   :  { %v142_v36 = vpop.f32.mrb[5].mxu0  ;;  %361 = vmatpush1.bf16.msra.mxu0 %v360_v32  ;;  %368 = vmatpush1.bf16.msra.mxu1 %v360_v32 }
 0x105   :  { %v146_v37 = vpop.f32.mrb[6].mxu0 }
 0x106   :  { %v364_v38 = vpack.c.bf16 %v146_v37, %v140_v35  ;;  %v148_v39 = vpop.f32.mrb[7].mxu0 }
 0x107   :  { %v362_v40 = vpack.c.bf16 %v148_v39, %v142_v36 }
 0x109   :  { %363 = vmatprep.subr.bf16.mxu0 %v362_v40  ;;  %367 = vmatprep.subr.bf16.mxu1 %v362_v40 }
 0x10a   :  { %365 = vmatpush1.bf16.msra.mxu0 %v364_v38  ;;  %369 = vmatpush1.bf16.msra.mxu1 %v364_v38 }
 0x10d   :  { %335 = vmatmul.mubr.msk.f32.vlgmr.msra.gmra.mrb[0].mxu1 %vm159_vm1, %v152_v41  ;;  %334 = vmatmul.mubr.msk.f32.vlgmr.msra.gmra.mrb[8].mxu0 %vm159_vm1, %v151_v42 }
 0x10e   :  { %260 = vmatprep.mubr.f32.mxu1 %v426_v0 }
 0x111   :  { %336 = vmatmul.mubr.msk.f32.gmra.mrb[2].mxu1 %vm159_vm1, %v153_v43 }
 0x112   :  { %266 = vmatprep.mubr.f32.mxu1 %v426_v0 }
 0x115   :  { %337 = vmatmul.mubr.msk.f32.gmra.mrb[4].mxu1 %vm159_vm1, %v154_v44 }
 0x116   :  { %272 = vmatprep.mubr.f32.mxu1 %v426_v0 }
 0x119   :  { %338 = vmatmul.mubr.msk.f32.gmra.mrb[6].mxu1 %vm159_vm1, %v155_v45 }
 0x11a   :  { %278 = vmatprep.mubr.f32.mxu1 %v426_v0 }
 0x11d   :  { %339 = vmatmul.mubr.msk.f32.gmra.mrb[8].mxu1 %vm159_vm1, %v156_v46 }
 0x11e   :  { %284 = vmatprep.mubr.f32.mxu1 %v426_v0 }
 0x121   :  { %340 = vmatmul.mubr.msk.f32.gmra.mrb[10].mxu1 %vm159_vm1, %v157_v47 }
 0x122   :  { %290 = vmatprep.mubr.f32.mxu1 %v426_v0 }
 0x125   :  { %341 = vmatmul.mubr.msk.f32.gmra.mrb[12].mxu1 %vm159_vm1, %v158_v48 }
 0x1e0   :  { %v256_v49 = vpop.f32.mrb[0].mxu1  ;;  %v250_v50 = vpop.f32.mrb[8].mxu0 }
 0x1e1   :  { %299 = vst [vmem:[#allocation5 + $0x10] sm:$0xff] %v256_v49  ;;  %v258_v51 = vpop.f32.mrb[1].mxu1  ;;  %297 = vst [vmem:[#allocation5] sm:$0xff] %v250_v50  ;;  %v252_v52 = vpop.f32.mrb[9].mxu0 }
 0x1e2   :  { %300 = vst [vmem:[#allocation5 + $0x18] sm:$0xff] %v258_v51  ;;  %298 = vst [vmem:[#allocation5 + $0x8] sm:$0xff] %v252_v52 }
 0x1e4   :  { %v262_v53 = vpop.f32.mrb[2].mxu1 }
 0x1e5   :  { %301 = vst [vmem:[#allocation5 + $0x20] sm:$0xff] %v262_v53  ;;  %v264_v54 = vpop.f32.mrb[3].mxu1 }
 0x1e6   :  { %302 = vst [vmem:[#allocation5 + $0x28] sm:$0xff] %v264_v54 }
 0x1e8   :  { %v268_v55 = vpop.f32.mrb[4].mxu1 }
 0x1e9   :  { %303 = vst [vmem:[#allocation5 + $0x30] sm:$0xff] %v268_v55  ;;  %v270_v56 = vpop.f32.mrb[5].mxu1 }
 0x1ea   :  { %304 = vst [vmem:[#allocation5 + $0x38] sm:$0xff] %v270_v56 }
 0x1ec   :  { %v274_v57 = vpop.f32.mrb[6].mxu1 }
 0x1ed   :  { %305 = vst [vmem:[#allocation5 + $0x40] sm:$0xff] %v274_v57  ;;  %v276_v58 = vpop.f32.mrb[7].mxu1 }
 0x1ee   :  { %306 = vst [vmem:[#allocation5 + $0x48] sm:$0xff] %v276_v58 }
 0x1f0   :  { %v280_v59 = vpop.f32.mrb[8].mxu1 }
 0x1f1   :  { %307 = vst [vmem:[#allocation5 + $0x50] sm:$0xff] %v280_v59  ;;  %v282_v60 = vpop.f32.mrb[9].mxu1 }
 0x1f2   :  { %308 = vst [vmem:[#allocation5 + $0x58] sm:$0xff] %v282_v60 }
 0x1f4   :  { %v286_v61 = vpop.f32.mrb[10].mxu1 }
 0x1f5   :  { %309 = vst [vmem:[#allocation5 + $0x60] sm:$0xff] %v286_v61  ;;  %v288_v62 = vpop.f32.mrb[11].mxu1 }
 0x1f6   :  { %310 = vst [vmem:[#allocation5 + $0x68] sm:$0xff] %v288_v62 }
 0x1f8   :  { %v292_v63 = vpop.f32.mrb[12].mxu1 }
 0x1f9   :  { %311 = vst [vmem:[#allocation5 + $0x70] sm:$0xff] %v292_v63  ;;  %v294_v0 = vpop.f32.mrb[13].mxu1 }
 0x1fa   :  { %312 = vst [vmem:[#allocation5 + $0x78] sm:$0xff] %v294_v0 }
 0x1fb   :  { %408 = shalt.err (!%p405_p12)
}
 0x1fc   :  { %s409_s26 = scalar_lea.hbm %s537_s3, 2048 }
 0x1fd   :  { %p410_p13 = scmp.ne.s32.totalorder %s537_s3, %s409_s26  ;;  %p413_p0 = scmp.lt.u32.totalorder %s409_s26, %s537_s3 }
 0x1ff   :  { %p415_p1 = pnand %p413_p0, %p410_p13 }
 0x201   :  { %418 = shalt.err (!%p415_p1)
}
 0x202   :  { %324 = dma.vmem_to_hbm [thread:$0]  %s319_s21, 2048, %s537_s3, [#allocation4], %s424_s22, %s424_s22, %s425_s23  }
 0x203   :  { %421 = dma.done.wait [#allocation4], 2048  }
 0x204   :  { %422 = vsyncadd [#allocation4], 4294965248 }
 0x205   :  { %328 = vsyncpa [#allocation3], 1 }
 0x206   :  { %329 = vsyncpa [#allocation4], 1 }

</bundles_post_ra>
